<compile_context>
chip_gen: v5e
topology: v5e:2x2
jax: 0.10.0
libtpu: 0.0.40
codegen_flags: <defaults>
</compile_context>

<pallas_src>
import math

import jax
import jax.numpy as jnp
from jax.experimental import pallas as pl
from jax.experimental.pallas import tpu as pltpu

_LANE = 128
_PER_STREAM_TILE_BYTES = 2 * 1024 * 1024  # ~2 MiB per x/out tile (safe on v5e/v6e/v7x)


def _add_pe_kernel(x_ref, pe_ref, o_ref):
    # x_ref / o_ref: (B, tL) lane-dense tile; pe_ref: (1, tL), broadcast over the
    # batch (sublane) axis by the VPU.
    o_ref[...] = x_ref[...] + pe_ref[...]


def make_pos_enc(d_model: int, max_seq_length: int, dtype=jnp.float32) -> jnp.ndarray:
    """Sinusoidal positional encoding, identical to the PyTorch __init__ (even or odd d_model)."""
    position = jnp.arange(0, max_seq_length, dtype=jnp.float32)[:, None]            # (L, 1)
    div_term = jnp.exp(
        jnp.arange(0, d_model, 2, dtype=jnp.float32) * (-math.log(10000.0) / d_model)
    )                                                                                # (ceil(D/2),)
    angles = position * div_term                                                     # (L, ceil(D/2))
    pe = jnp.zeros((max_seq_length, d_model), dtype=jnp.float32)
    pe = pe.at[:, 0::2].set(jnp.sin(angles))
    pe = pe.at[:, 1::2].set(jnp.cos(angles[:, : d_model // 2]))                      # guard odd D
    return pe[None, :, :].astype(dtype)                                              # (1, L, D)


def _pick_tile(flat_len: int, batch: int, itemsize: int) -> int:
    """Lane-dense tile (multiple of 128) along the flattened S*D axis, ~2 MiB per x tile."""
    budget_elems = max(_LANE, _PER_STREAM_TILE_BYTES // (max(batch, 1) * itemsize))
    tile = (min(flat_len, budget_elems) // _LANE) * _LANE
    return tile if tile > 0 else flat_len  # flat_len < 128 -> single full-extent block


def positional_encoding_forward(x: jnp.ndarray, pos_enc: jnp.ndarray) -> jnp.ndarray:
    """x: (B, S, D); pos_enc: (1, max_seq_length, D). Returns x + pos_enc[:, :S]."""
    B, S, D = x.shape
    L = S * D

    pe = pos_enc.astype(x.dtype)                 # do the add in x's dtype (bf16-friendly)
    x2 = x.reshape(B, L)                         # free contiguous reshapes -> lane-dense last dim
    pe2 = pe.reshape(1, pe.shape[1] * D)

    tL = _pick_tile(L, B, x.dtype.itemsize)
    if tL % _LANE != 0:
        # Tiny case (L < 128): block must equal the full last-dim extent, so trim pe to L.
        pe2 = pe2[:, :L]

    num_tiles = pl.cdiv(L, tL)

    out2 = pl.pallas_call(
        _add_pe_kernel,
        out_shape=jax.ShapeDtypeStruct((B, L), x.dtype),
        grid_spec=pltpu.PrefetchScalarGridSpec(
            num_scalar_prefetch=0,
            grid=(num_tiles,),
            in_specs=[
                pl.BlockSpec((B, tL), lambda l: (0, l)),   # whole batch in the sublane axis
                pl.BlockSpec((1, tL), lambda l: (0, l)),   # PE tile read once per L-tile
            ],
            out_specs=pl.BlockSpec((B, tL), lambda l: (0, l)),
        ),
        compiler_params=pltpu.CompilerParams(
            dimension_semantics=("parallel",),
        ),
    )(x2, pe2)

    return out2.reshape(B, S, D)


if __name__ == "__main__":
    d_model = 32
    max_seq_length = 16
    batch = 2
    seq = 8

    key = jax.random.PRNGKey(0)
    x = jax.random.normal(key, (batch, seq, d_model), dtype=jnp.float32)

    pos_enc = make_pos_enc(d_model, max_seq_length)

    out = positional_encoding_forward(x, pos_enc)
    out = jax.block_until_ready(out)

    # correctness check against plain-JAX reference
    ref = x + pos_enc[:, :seq, :]
    assert out.shape == (batch, seq, d_model)
    assert jnp.allclose(out, ref, atol=1e-6), "mismatch vs reference"

    print("KERNEL_OK")
</pallas_src>

<mosaic_0001>
module attributes {stable_mosaic.version = 11 : i64} {
  func.func @_add_pe_kernel(%arg0: i32, %arg1: memref<2x256xf32, #tpu.memory_space<vmem>>, %arg2: memref<1x256xf32, #tpu.memory_space<vmem>>, %arg3: memref<2x256xf32, #tpu.memory_space<vmem>>) attributes {dimension_semantics = [#tpu.dimension_semantics<parallel>], iteration_bounds = array<i64: 1>, scalar_prefetch = 0 : i64, scratch_operands = 0 : i64, tpu.core_type = #tpu.core_type<tc>, window_params = [{transform_indices = @transform_0, window_bounds = array<i64: 2, 256>}, {transform_indices = @transform_1, window_bounds = array<i64: 1, 256>}, {transform_indices = @transform_2, window_bounds = array<i64: 2, 256>}]} {
    %c0 = arith.constant 0 : index
    %c0_0 = arith.constant 0 : index
    %0 = vector.load %arg1[%c0, %c0_0] : memref<2x256xf32, #tpu.memory_space<vmem>>, vector<2x256xf32>
    %c0_1 = arith.constant 0 : index
    %c0_2 = arith.constant 0 : index
    %1 = vector.load %arg2[%c0_1, %c0_2] : memref<1x256xf32, #tpu.memory_space<vmem>>, vector<1x256xf32>
    %2 = vector.broadcast %1 : vector<1x256xf32> to vector<2x256xf32>
    %3 = arith.addf %0, %2 : vector<2x256xf32>
    %c0_3 = arith.constant 0 : index
    %c0_4 = arith.constant 0 : index
    %4 = vector.load %arg3[%c0_3, %c0_4] : memref<2x256xf32, #tpu.memory_space<vmem>>, vector<2x256xf32>
    tpu.vector_store %arg3[%c0_3, %c0_4], %3 {strides = array<i32>} : memref<2x256xf32, #tpu.memory_space<vmem>>, vector<2x256xf32>,
    return
  }
  func.func @transform_0(%arg0: i32) -> (i32, i32) {
    %c0_i32 = arith.constant 0 : i32
    %c0_i32_0 = arith.constant 0 : i32
    return %c0_i32, %arg0 : i32, i32
  }
  func.func @transform_1(%arg0: i32) -> (i32, i32) {
    %c0_i32 = arith.constant 0 : i32
    %c0_i32_0 = arith.constant 0 : i32
    return %c0_i32, %arg0 : i32, i32
  }
  func.func @transform_2(%arg0: i32) -> (i32, i32) {
    %c0_i32 = arith.constant 0 : i32
    %c0_i32_0 = arith.constant 0 : i32
    return %c0_i32, %arg0 : i32, i32
  }
}

</mosaic_0001>

<bundles_post_ra>
// kernel: tpu_custom_call.1
= control target key start
LH: loop header
LB: loop body
LE: loop exit
PB: predicated region body
PF: predicated region fallthrough
CT: control target
= control target key end

     0   :  { %7 = vsyncpa [#allocation3], 0  ;;  %s177_s0 = inlined_call_operand.hbm [shape: f32[2,256], index: 0, kind: input, shape index: {}]   ;;  %s178_s1 = inlined_call_operand.hbm [shape: f32[1,512], index: 1, kind: input, shape index: {}]   ;;  %s179_s2 = inlined_call_operand.hbm [shape: f32[2,256], index: 2, kind: output, shape index: {}]  }
   0x1   :  { %8 = vsyncpa [#allocation6], 0 }
   0x2   :  { %9 = vsyncpa [#allocation4], 0  ;;  %s15_s11 = sshll.u32 %s177_s0, 4  ;;  %s150_s12 = smov [#allocation2]   ;;  %s16_s11 = int_to_ptr.hbm [resolvable:$true] %s15_s11 }
   0x3   :  { %s17_s13 = sshll.u32 %s150_s12, 4  ;;  %s26_s16 = sshll.u32 %s178_s1, 4  ;;  %s18_s13 = int_to_ptr.vmem [resolvable:$true] %s17_s13  ;;  %s27_s16 = int_to_ptr.hbm [resolvable:$true] %s26_s16 }
   0x4   :  { %20 = dma.hbm_to_vmem [thread:$0]  %s16_s11, 64, %s18_s13, [#allocation3]  }
   0x5   :  { %s151_s17 = smov [#allocation5]  }
   0x6   :  { %s28_s18 = sshll.u32 %s151_s17, 4  ;;  %s29_s18 = int_to_ptr.vmem [resolvable:$true] %s28_s18 }
   0x7   :  { %31 = dma.hbm_to_vmem [thread:$0]  %s27_s16, 32, %s29_s18, [#allocation6]  }
   0x8   :  { %144 = dma.done.wait [#allocation3], 64  }
   0x9   :  { %145 = vsyncadd [#allocation3], 4294967232 }
   0xa   :  { %146 = dma.done.wait [#allocation6], 32  }
   0xb   :  { %147 = vsyncadd [#allocation6], 4294967264  ;;  %v41_v0 = vld [vmem:[#allocation5] sm:$0x3]  ;;  %vm46_vm0 = vcmask 1041408   ;;  %s152_s0 = smov [#allocation7]  }
   0xc   :  { %v43_v1 = vperm.slane %v41_v0, 0  ;;  %v44_v2 = vperm.slane %v41_v0, 1  ;;  %v40_v3 = vld [vmem:[#allocation2] sm:$0xf]  ;;  %s56_s19 = sshll.u32 %s152_s0, 4  ;;  %s58_s21 = sshll.u32 %s179_s2, 4  ;;  %s57_s19 = int_to_ptr.vmem [resolvable:$true] %s56_s19  ;;  %s59_s21 = int_to_ptr.hbm [resolvable:$true] %s58_s21 }
   0xe   :  { %v45_v4 = vrot.slane %v44_v2, 6 }
  0x10   :  { %v47_v5 = vsel %vm46_vm0, %v43_v1, %v45_v4 }
  0x11   :  { %v49_v6 = vadd.f32 %v47_v5, %v40_v3 }
  0x13   :  { %50 = vst [vmem:[#allocation7] sm:$0xf] %v49_v6 }
  0x14   :  { %61 = dma.vmem_to_hbm [thread:$0]  %s57_s19, 64, %s59_s21, [#allocation4]  }
  0x15   :  { %148 = dma.done.wait [#allocation4], 64  }
  0x16   :  { %149 = vsyncadd [#allocation4], 4294967232 }
  0x17   :  { %66 = vsyncpa [#allocation3], 1 }
  0x18   :  { %67 = vsyncpa [#allocation6], 1 }
  0x19   :  { %68 = vsyncpa [#allocation4], 1 }

</bundles_post_ra>
